<compile_context>
chip_gen: v7x
topology: tpu7x:2x2x1
jax: 0.10.0
libtpu: 0.0.40
codegen_flags: <defaults>
</compile_context>

<pallas_src>
import functools

import numpy as np
import jax
import jax.numpy as jnp
from jax import lax
from jax.experimental import pallas as pl
from jax.experimental.pallas import tpu as pltpu


def _round_up(v, m):
    return (v + m - 1) // m * m


# ----------------------------- kernel -------------------------------------------------
def _bce_blur_kernel(x_ref, y_ref, out_ref, acc_ref, *, n_valid, inv_alpha,
                     block_rows, lanes, steps_per_core):
    c = pl.program_id(0)            # core (parallel) axis
    s = pl.program_id(1)            # reduction (arbitrary) axis
    blk = c * steps_per_core + s    # logical row-block id

    @pl.when(s == 0)
    def _():
        acc_ref[...] = jnp.zeros_like(acc_ref)

    x = x_ref[...].astype(jnp.float32)
    y = y_ref[...].astype(jnp.float32)

    # exp(-|x|) is reused for both softplus and sigmoid -> 3 transcendentals total.
    e = jnp.exp(-jnp.abs(x))
    bce = jnp.maximum(x, 0.0) - x * y + jnp.log1p(e)          # stable BCE-with-logits
    t = pl.reciprocal(1.0 + e)                                # 1 / (1 + exp(-|x|))
    p = jnp.where(x >= 0.0, t, e * t)                         # sigmoid(x), no 2nd exp
    alpha_factor = 1.0 - jnp.exp((p - y - 1.0) * inv_alpha)   # 1/(alpha+1e-4) baked in
    loss = bce * alpha_factor

    # Only blocks that can contain padded / out-of-range elements pay for the mask.
    block_elems = block_rows * lanes
    need_mask = (blk + 1) * block_elems > n_valid

    @pl.when(jnp.logical_not(need_mask))
    def _():
        acc_ref[...] += loss                                  # hot path: pure VALU adds

    @pl.when(need_mask)
    def _():
        row_ids = lax.broadcasted_iota(jnp.int32, loss.shape, 0)
        lane_ids = lax.broadcasted_iota(jnp.int32, loss.shape, 1)
        flat = (blk * block_rows + row_ids) * lanes + lane_ids
        # select (not multiply-by-mask): garbage tail rows may hold NaN/Inf
        acc_ref[...] += jnp.where(flat < n_valid, loss, 0.0)

    @pl.when(s == pl.num_programs(1) - 1)
    def _():
        col = jnp.sum(acc_ref[...], axis=0, keepdims=True)    # (1, lanes) column sums
        out_ref[...] = jnp.broadcast_to(col[None], (1, 8, lanes))


# ----------------------------- wrapper -------------------------------------------------
def bce_blur_with_logits_loss(pred, true, alpha=0.05, *, lanes=512,
                              max_block_rows=1024, num_cores=2):
    """Forward pass of BCEBlurWithLogitsLoss. `lanes` must be a multiple of 128."""
    assert pred.shape == true.shape
    assert lanes % 128 == 0
    n = int(np.prod(pred.shape))

    x = pred.reshape(-1)
    y = true.reshape(-1)

    rows = int(pl.cdiv(n, lanes))
    padded = rows * lanes
    if padded != n:
        # Ragged n only: pad the flat tail to the next lane multiple (costs one copy).
        x = jnp.pad(x, (0, padded - n))
        y = jnp.pad(y, (0, padded - n))
    x2 = x.reshape(rows, lanes)          # free reshape of a contiguous array
    y2 = y.reshape(rows, lanes)

    itemsize = jnp.dtype(pred.dtype).itemsize
    sub = max(8, 32 // itemsize)         # packed sublane multiple: 8/16/32 for f32/bf16/8-bit
    block_rows = min(_round_up(max_block_rows, sub), _round_up(rows, sub))

    num_blocks = int(pl.cdiv(rows, block_rows))
    steps_per_core = int(pl.cdiv(num_blocks, num_cores))

    tile_bytes = block_rows * lanes * itemsize
    acc_bytes = block_rows * lanes * 4
    vmem_limit = int(2 * 2 * tile_bytes + acc_bytes + (6 << 20))

    def in_map(c, s):
        # Clamp so over-provisioned (c, s) steps re-read the last valid block; the kernel
        # masks them out (their global flat indices are >= n).
        return (jnp.minimum(c * steps_per_core + s, num_blocks - 1), 0)

    kern = functools.partial(
        _bce_blur_kernel,
        n_valid=n,
        inv_alpha=1.0 / (float(alpha) + 1e-4),
        block_rows=block_rows,
        lanes=lanes,
        steps_per_core=steps_per_core,
    )

    partials = pl.pallas_call(
        kern,
        out_shape=jax.ShapeDtypeStruct((num_cores, 8, lanes), jnp.float32),
        grid=(num_cores, steps_per_core),
        in_specs=[pl.BlockSpec((block_rows, lanes), in_map),
                  pl.BlockSpec((block_rows, lanes), in_map)],
        out_specs=pl.BlockSpec((1, 8, lanes), lambda c, s: (c, 0, 0)),
        scratch_shapes=[pltpu.VMEM((block_rows, lanes), jnp.float32)],
        compiler_params=pltpu.CompilerParams(
            dimension_semantics=("parallel", "arbitrary"),
            vmem_limit_bytes=vmem_limit),
    )(x2, y2)

    # Tiny final combine in the wrapper: per-core column sums (row 0 of each core's
    # replicated block) -> grand total -> mean.
    total = jnp.sum(partials[:, 0, :])
    return total / n


# ----------------------------- pure-JAX reference --------------------------------------
def _reference(pred, true, alpha=0.05):
    x = pred.astype(jnp.float32)
    y = true.astype(jnp.float32)
    bce = jnp.maximum(x, 0.0) - x * y + jnp.log1p(jnp.exp(-jnp.abs(x)))
    p = jax.nn.sigmoid(x)
    factor = 1.0 - jnp.exp((p - y - 1.0) / (alpha + 1e-4))
    return jnp.mean(bce * factor)


# ----------------------------- main -----------------------------------------------------
if __name__ == "__main__":
    key = jax.random.PRNGKey(0)
    k1, k2, k3, k4, k5, k6 = jax.random.split(key, 6)

    # Primary case: (batch=2, channels=4, 16x16 spatial), hard 0/1 targets.
    pred = jax.random.normal(k1, (2, 4, 16, 16), jnp.float32) * 2.0
    true = (jax.random.uniform(k2, (2, 4, 16, 16)) > 0.7).astype(jnp.float32)
    out = jax.block_until_ready(bce_blur_with_logits_loss(pred, true, alpha=0.05))
    ref = jax.block_until_ready(_reference(pred, true, alpha=0.05))
    np.testing.assert_allclose(np.asarray(out), np.asarray(ref), rtol=2e-5, atol=1e-6)

    # Odd-sized case, soft targets: exercises the ragged-tail pad + masked block path.
    pred2 = jax.random.normal(k3, (3, 5, 7, 11), jnp.float32)
    true2 = jax.random.uniform(k4, (3, 5, 7, 11), jnp.float32)
    out2 = jax.block_until_ready(
        bce_blur_with_logits_loss(pred2, true2, alpha=0.05, lanes=128, max_block_rows=8))
    ref2 = jax.block_until_ready(_reference(pred2, true2, alpha=0.05))
    np.testing.assert_allclose(np.asarray(out2), np.asarray(ref2), rtol=2e-5, atol=1e-6)

    # Multi-step case: grid = (2 cores, 4 steps/core) exercises resident accumulation.
    pred3 = jax.random.normal(k5, (2, 4, 32, 32), jnp.float32)
    true3 = jax.random.uniform(k6, (2, 4, 32, 32), jnp.float32)
    out3 = jax.block_until_ready(
        bce_blur_with_logits_loss(pred3, true3, alpha=0.05, lanes=128, max_block_rows=8))
    ref3 = jax.block_until_ready(_reference(pred3, true3, alpha=0.05))
    np.testing.assert_allclose(np.asarray(out3), np.asarray(ref3), rtol=2e-5, atol=1e-6)

    assert np.isfinite(np.asarray(out)) and np.isfinite(np.asarray(out2)) and np.isfinite(np.asarray(out3))
    print("KERNEL_OK")
</pallas_src>

<mosaic_0001>
module attributes {stable_mosaic.version = 11 : i64} {
  func.func @_bce_blur_kernel(%arg0: i32, %arg1: i32, %arg2: memref<8x512xf32, #tpu.memory_space<vmem>>, %arg3: memref<8x512xf32, #tpu.memory_space<vmem>>, %arg4: memref<1x8x512xf32, #tpu.memory_space<vmem>>, %arg5: memref<8x512xf32, #tpu.memory_space<vmem>>) attributes {dimension_semantics = [#tpu.dimension_semantics<parallel>, #tpu.dimension_semantics<arbitrary>], iteration_bounds = array<i64: 2, 1>, scalar_prefetch = 0 : i64, scratch_operands = 1 : i64, tpu.core_type = #tpu.core_type<tc>, window_params = [{transform_indices = @transform_0, window_bounds = array<i64: 8, 512>}, {transform_indices = @transform_1, window_bounds = array<i64: 8, 512>}, {transform_indices = @transform_2, window_bounds = array<i64: 1, 8, 512>}]} {
    %c1_i32 = arith.constant 1 : i32
    %0 = arith.muli %arg0, %c1_i32 : i32
    %1 = arith.addi %0, %arg1 : i32
    %c0_i32 = arith.constant 0 : i32
    %2 = arith.cmpi eq, %arg1, %c0_i32 : i32
    %3 = arith.extui %2 : i1 to i32
    %c0_i32_0 = arith.constant 0 : i32
    %4 = arith.cmpi ne, %3, %c0_i32_0 : i32
    scf.if %4 {
      %cst_15 = arith.constant 0.000000e+00 : f32
      %44 = vector.broadcast %cst_15 : f32 to vector<8x512xf32>
      %c0_16 = arith.constant 0 : index
      %c0_17 = arith.constant 0 : index
      %45 = vector.load %arg5[%c0_16, %c0_17] : memref<8x512xf32, #tpu.memory_space<vmem>>, vector<8x512xf32>
      tpu.vector_store %arg5[%c0_16, %c0_17], %44 {strides = array<i32>} : memref<8x512xf32, #tpu.memory_space<vmem>>, vector<8x512xf32>,
    } else {
    }
    %c0 = arith.constant 0 : index
    %c0_1 = arith.constant 0 : index
    %5 = vector.load %arg2[%c0, %c0_1] : memref<8x512xf32, #tpu.memory_space<vmem>>, vector<8x512xf32>
    %c0_2 = arith.constant 0 : index
    %c0_3 = arith.constant 0 : index
    %6 = vector.load %arg3[%c0_2, %c0_3] : memref<8x512xf32, #tpu.memory_space<vmem>>, vector<8x512xf32>
    %7 = math.absf %5 : vector<8x512xf32>
    %cst = arith.constant 0.000000e+00 : f32
    %8 = vector.broadcast %cst : f32 to vector<8x512xf32>
    %9 = arith.subf %8, %7 : vector<8x512xf32>
    %10 = math.exp %9 : vector<8x512xf32>
    %cst_4 = arith.constant 0.000000e+00 : f32
    %11 = vector.broadcast %cst_4 : f32 to vector<8x512xf32>
    %12 = arith.maximumf %5, %11 : vector<8x512xf32>
    %13 = arith.mulf %5, %6 : vector<8x512xf32>
    %14 = arith.subf %12, %13 : vector<8x512xf32>
    %15 = math.log1p %10 : vector<8x512xf32>
    %16 = arith.addf %14, %15 : vector<8x512xf32>
    %cst_5 = arith.constant 1.000000e+00 : f32
    %17 = vector.broadcast %cst_5 : f32 to vector<8x512xf32>
    %18 = arith.addf %17, %10 : vector<8x512xf32>
    %19 = tpu.reciprocal %18 : vector<8x512xf32> -> vector<8x512xf32>
    %cst_6 = arith.constant 0.000000e+00 : f32
    %20 = vector.broadcast %cst_6 : f32 to vector<8x512xf32>
    %21 = arith.cmpf oge, %5, %20 : vector<8x512xf32>
    %22 = arith.mulf %10, %19 : vector<8x512xf32>
    %23 = arith.select %21, %19, %22 : vector<8x512xi1>, vector<8x512xf32>
    %24 = arith.subf %23, %6 : vector<8x512xf32>
    %cst_7 = arith.constant 1.000000e+00 : f32
    %25 = vector.broadcast %cst_7 : f32 to vector<8x512xf32>
    %26 = arith.subf %24, %25 : vector<8x512xf32>
    %cst_8 = arith.constant 19.9600792 : f32
    %27 = vector.broadcast %cst_8 : f32 to vector<8x512xf32>
    %28 = arith.mulf %26, %27 : vector<8x512xf32>
    %29 = math.exp %28 : vector<8x512xf32>
    %cst_9 = arith.constant 1.000000e+00 : f32
    %30 = vector.broadcast %cst_9 : f32 to vector<8x512xf32>
    %31 = arith.subf %30, %29 : vector<8x512xf32>
    %32 = arith.mulf %16, %31 : vector<8x512xf32>
    %c1_i32_10 = arith.constant 1 : i32
    %33 = arith.addi %1, %c1_i32_10 : i32
    %c4096_i32 = arith.constant 4096 : i32
    %34 = arith.muli %33, %c4096_i32 : i32
    %c2048_i32 = arith.constant 2048 : i32
    %35 = arith.cmpi sgt, %34, %c2048_i32 : i32
    %true = arith.constant true
    %36 = arith.xori %35, %true : i1
    %37 = arith.extui %36 : i1 to i32
    %c0_i32_11 = arith.constant 0 : i32
    %38 = arith.cmpi ne, %37, %c0_i32_11 : i32
    scf.if %38 {
      %c0_15 = arith.constant 0 : index
      %c0_16 = arith.constant 0 : index
      %44 = vector.load %arg5[%c0_15, %c0_16] : memref<8x512xf32, #tpu.memory_space<vmem>>, vector<8x512xf32>
      %45 = arith.addf %44, %32 : vector<8x512xf32>
      %c0_17 = arith.constant 0 : index
      %c0_18 = arith.constant 0 : index
      %46 = vector.load %arg5[%c0_17, %c0_18] : memref<8x512xf32, #tpu.memory_space<vmem>>, vector<8x512xf32>
      tpu.vector_store %arg5[%c0_17, %c0_18], %45 {strides = array<i32>} : memref<8x512xf32, #tpu.memory_space<vmem>>, vector<8x512xf32>,
    } else {
    }
    %39 = arith.extui %35 : i1 to i32
    %c0_i32_12 = arith.constant 0 : i32
    %40 = arith.cmpi ne, %39, %c0_i32_12 : i32
    scf.if %40 {
      %44 = tpu.iota {dimensions = array<i32: 0>} : vector<8x512xi32>
      %45 = tpu.iota {dimensions = array<i32: 1>} : vector<8x512xi32>
      %c8_i32 = arith.constant 8 : i32
      %46 = arith.muli %1, %c8_i32 : i32
      %47 = vector.broadcast %46 : i32 to vector<8x512xi32>
      %48 = arith.addi %47, %44 : vector<8x512xi32>
      %c512_i32 = arith.constant 512 : i32
      %49 = vector.broadcast %c512_i32 : i32 to vector<8x512xi32>
      %50 = arith.muli %48, %49 : vector<8x512xi32>
      %51 = arith.addi %50, %45 : vector<8x512xi32>
      %c0_15 = arith.constant 0 : index
      %c0_16 = arith.constant 0 : index
      %52 = vector.load %arg5[%c0_15, %c0_16] : memref<8x512xf32, #tpu.memory_space<vmem>>, vector<8x512xf32>
      %c2048_i32_17 = arith.constant 2048 : i32
      %53 = vector.broadcast %c2048_i32_17 : i32 to vector<8x512xi32>
      %54 = arith.cmpi slt, %51, %53 : vector<8x512xi32>
      %cst_18 = arith.constant 0.000000e+00 : f32
      %55 = vector.broadcast %cst_18 : f32 to vector<8x512xf32>
      %56 = arith.select %54, %32, %55 : vector<8x512xi1>, vector<8x512xf32>
      %57 = arith.addf %52, %56 : vector<8x512xf32>
      %c0_19 = arith.constant 0 : index
      %c0_20 = arith.constant 0 : index
      %58 = vector.load %arg5[%c0_19, %c0_20] : memref<8x512xf32, #tpu.memory_space<vmem>>, vector<8x512xf32>
      tpu.vector_store %arg5[%c0_19, %c0_20], %57 {strides = array<i32>} : memref<8x512xf32, #tpu.memory_space<vmem>>, vector<8x512xf32>,
    } else {
    }
    %c0_i32_13 = arith.constant 0 : i32
    %41 = arith.cmpi eq, %arg1, %c0_i32_13 : i32
    %42 = arith.extui %41 : i1 to i32
    %c0_i32_14 = arith.constant 0 : i32
    %43 = arith.cmpi ne, %42, %c0_i32_14 : i32
    scf.if %43 {
      %c0_15 = arith.constant 0 : index
      %c0_16 = arith.constant 0 : index
      %44 = vector.load %arg5[%c0_15, %c0_16] : memref<8x512xf32, #tpu.memory_space<vmem>>, vector<8x512xf32>
      %cst_17 = arith.constant dense<0.000000e+00> : vector<512xf32>
      %45 = vector.multi_reduction <add>, %44, %cst_17 [0] : vector<8x512xf32> to vector<512xf32>
      %46 = vector.shape_cast %45 : vector<512xf32> to vector<1x512xf32>
      %47 = vector.shape_cast %46 : vector<1x512xf32> to vector<1x1x512xf32>
      %48 = vector.shape_cast %47 : vector<1x1x512xf32> to vector<1x1x512xf32>
      %49 = vector.broadcast %48 : vector<1x1x512xf32> to vector<1x8x512xf32>
      %c0_18 = arith.constant 0 : index
      %c0_19 = arith.constant 0 : index
      %c0_20 = arith.constant 0 : index
      %50 = vector.load %arg4[%c0_18, %c0_19, %c0_20] : memref<1x8x512xf32, #tpu.memory_space<vmem>>, vector<1x8x512xf32>
      tpu.vector_store %arg4[%c0_18, %c0_19, %c0_20], %49 {strides = array<i32>} : memref<1x8x512xf32, #tpu.memory_space<vmem>>, vector<1x8x512xf32>,
    } else {
    }
    return
  }
  func.func @transform_0(%arg0: i32, %arg1: i32) -> (i32, i32) {
    %c1_i32 = arith.constant 1 : i32
    %0 = arith.muli %arg0, %c1_i32 : i32
    %1 = arith.addi %0, %arg1 : i32
    %c0_i32 = arith.constant 0 : i32
    %2 = arith.minsi %1, %c0_i32 : i32
    %c0_i32_0 = arith.constant 0 : i32
    %c0_i32_1 = arith.constant 0 : i32
    return %2, %c0_i32_0 : i32, i32
  }
  func.func @transform_1(%arg0: i32, %arg1: i32) -> (i32, i32) {
    %c1_i32 = arith.constant 1 : i32
    %0 = arith.muli %arg0, %c1_i32 : i32
    %1 = arith.addi %0, %arg1 : i32
    %c0_i32 = arith.constant 0 : i32
    %2 = arith.minsi %1, %c0_i32 : i32
    %c0_i32_0 = arith.constant 0 : i32
    %c0_i32_1 = arith.constant 0 : i32
    return %2, %c0_i32_0 : i32, i32
  }
  func.func @transform_2(%arg0: i32, %arg1: i32) -> (i32, i32, i32) {
    %c0_i32 = arith.constant 0 : i32
    %c0_i32_0 = arith.constant 0 : i32
    %c0_i32_1 = arith.constant 0 : i32
    return %arg0, %c0_i32, %c0_i32_0 : i32, i32, i32
  }
}

</mosaic_0001>

<bundles_post_ra>
// kernel: tpu_custom_call.1
= control target key start
LH: loop header
LB: loop body
LE: loop exit
PB: predicated region body
PF: predicated region fallthrough
CT: control target
= control target key end

     0   :  { %7 = vsyncpa [#allocation4], 0  ;;  %s1249_s0 = inlined_call_operand.hbm [shape: f32[4,512], index: 0, kind: input, shape index: {}]   ;;  %s1250_s1 = inlined_call_operand.hbm [shape: f32[4,512], index: 1, kind: input, shape index: {}]   ;;  %s1251_s2 = inlined_call_operand.hbm [shape: f32[2,8,512], index: 2, kind: output, shape index: {}]  }
   0x1   :  { %9 = vsyncpa [#allocation4 + $0x1], 0 }
   0x2   :  { %10 = vsyncpa [#allocation7], 0 }
   0x3   :  { %12 = vsyncpa [#allocation7 + $0x1], 0 }
   0x4   :  { %13 = vsyncpa [#allocation5], 0 }
   0x5   :  { %15 = vsyncpa [#allocation5 + $0x1], 0  ;;  %s981_s9 = smov 0   ;;  %s983_s10 = smov 0  }
   0x6   :  { %s985_s11 = smov 0   ;;  %s987_s12 = smov 0  }
   0x7   :  { %s989_s13 = smov 0   ;;  %s991_s14 = smov 0  }
   0x8   :  { %s993_s15 = smov 0   ;;  %s995_s16 = smov 0  }
   0x9 LB: > { %s623_s17 = sadd.s32 4294967295, %s956_s16   ;;  %s624_s18 = sadd.s32 4294967294, %s956_s16   ;;  %s956_s16 = sphi %s995_s16, %s21_s16   ;;  %s952_s15 = sphi %s993_s15, %s1267_s15   ;;  %s948_s14 = sphi %s991_s14, %s1266_s14   ;;  %s944_s13 = sphi %s989_s13, %s1239_s13   ;;  %s940_s12 = sphi %s987_s12, %s1265_s12   ;;  %s936_s11 = sphi %s985_s11, %s1264_s11   ;;  %s932_s10 = sphi %s983_s10, %s1263_s10   ;;  %s928_s9 = sphi %s981_s9, %s1262_s9  }
   0xa   : > { %s33_s19 = sadd.s32 1, %s952_s15  ;;  %p925_p1 = scmp.ne.s32.totalorder %s944_s13, 0 }
   0xb   : > { %p35_p0 = scmp.ge.s32.totalorder %s33_s19, 2  ;;  %p54_p2 = scmp.eq.s32.totalorder %s956_s16, 0 }
   0xc   : > { %p59_p3 = scmp.ne.s32.totalorder %s944_s13, %s940_s12  ;;  %p60_p5 = scmp.eq.s32.totalorder %s623_s17, 0 }
   0xd   : > { %s1269_s19 = smov (%p35_p0, %s33_s19), 0  ;;  %p1027_p4 = por %p925_p1, %p54_p2 }
   0xe   : > { %p1031_p6 = por %p60_p5, %p59_p3  ;;  %s101_s22 = ssub.s32 %s952_s15, %s1269_s19 }
   0xf   : > { %p102_p7 = scmp.eq.s32.totalorder %s101_s22, 0  ;;  %s104_s23 = sadd.s32 1, %s936_s11 }
  0x10   : > { %p114_p8 = scmp.ne.s32.totalorder %s936_s11, %s932_s10  ;;  %p115_p9 = scmp.eq.s32.totalorder %s623_s17, 1 }
  0x11   : > { %s1039_s24 = scalar_select %p102_p7, %s936_s11, %s104_s23  }
  0x12   : > { %p120_p10 = scmp.ne.s32.totalorder %s932_s10, %s928_s9  ;;  %p121_p11 = scmp.eq.s32.totalorder %s624_s18, 1 }
  0x13   : > { %p1045_p12 = por %p115_p9, %p114_p8  ;;  %p1252_p0 = scmp.ge.s32.totalorder %s956_s16, 2 }
  0x14   : > { %p1049_p13 = por %p121_p11, %p120_p10 }
  0x15   : > { %137 = sbr.rel (%p1252_p0) target bundleno = 82 (0x52), region = 16 }
  0x1c   : > { %140 = sbr.rel (!%p1027_p4) target bundleno = 55 (0x37), region = 20 }
  0x23   : > { %155 = vsyncadd [#allocation4], 256  ;;  %s958_s27 = smov [#allocation3]   ;;  %s789_s3 = scalar_lea.hbm %s1249_s0, 256 }
  0x24   : > { %s161_s28 = sshll.u32 %s958_s27, 4  ;;  %p790_p1 = scmp.ne.s32.totalorder %s1249_s0, %s789_s3  ;;  %s162_s28 = int_to_ptr.vmem [resolvable:$true] %s161_s28 }
  0x25   : > { %p795_p2 = scmp.lt.u32.totalorder %s789_s3, %s789_s3  ;;  %p797_p3 = scmp.lt.u32.totalorder %s789_s3, %s1249_s0 }
  0x27   : > { %p798_p5 = por %p797_p3, %p795_p2 }
  0x29   : > { %p799_p7 = pnand %p798_p5, %p790_p1 }
  0x2b   : > { %802 = shalt.err (!%p799_p7)
}
  0x2c   : > { %s803_s8 = scalar_lea.vmem %s162_s28, 256  ;;  %s809_s12 = scalar_lea.vmem %s162_s28, 1024 }
  0x2d   : > { %p804_p8 = scmp.ne.s32.totalorder %s162_s28, %s803_s8  ;;  %p810_p9 = scmp.lt.s32.totalorder %s162_s28, %s162_s28 }
  0x2e   : > { %p811_p10 = scmp.lt.s32.totalorder %s809_s12, %s803_s8 }
  0x30   : > { %p812_p11 = por %p811_p10, %p810_p9 }
  0x32   : > { %p813_p0 = pnand %p812_p11, %p804_p8 }
  0x34   : > { %816 = shalt.err (!%p813_p0)
}
  0x35   : > { %s959_s17 = smov 256   ;;  %s960_s18 = smov 16  }
  0x36   : > { %167 = dma.hbm_to_vmem [thread:$0]  %s1249_s0, 256, %s162_s28, [#allocation4], %s959_s17, %s959_s17, %s960_s18  }
  0x37 PF: > { %170 = sbr.rel (!%p1027_p4) target bundleno = 82 (0x52), region = 24 }
  0x3e   : > { %185 = vsyncadd [#allocation7], 256  ;;  %s961_s27 = smov [#allocation6]   ;;  %s817_s4 = scalar_lea.hbm %s1250_s1, 256 }
  0x3f   : > { %s191_s29 = sshll.u32 %s961_s27, 4  ;;  %p818_p0 = scmp.ne.s32.totalorder %s1250_s1, %s817_s4  ;;  %s192_s29 = int_to_ptr.vmem [resolvable:$true] %s191_s29 }
  0x40   : > { %p823_p1 = scmp.lt.u32.totalorder %s817_s4, %s817_s4  ;;  %p825_p2 = scmp.lt.u32.totalorder %s817_s4, %s1250_s1 }
  0x42   : > { %p826_p3 = por %p825_p2, %p823_p1 }
  0x44   : > { %p827_p5 = pnand %p826_p3, %p818_p0 }
  0x46   : > { %830 = shalt.err (!%p827_p5)
}
  0x47   : > { %s831_s20 = scalar_lea.vmem %s192_s29, 256  ;;  %s837_s28 = scalar_lea.vmem %s192_s29, 1024 }
  0x48   : > { %p832_p4 = scmp.ne.s32.totalorder %s192_s29, %s831_s20  ;;  %p838_p7 = scmp.lt.s32.totalorder %s192_s29, %s192_s29 }
  0x49   : > { %p839_p8 = scmp.lt.s32.totalorder %s837_s28, %s831_s20 }
  0x4b   : > { %p840_p9 = por %p839_p8, %p838_p7 }
  0x4d   : > { %p841_p10 = pnand %p840_p9, %p832_p4 }
  0x4f   : > { %844 = shalt.err (!%p841_p10)
}
  0x50   : > { %s962_s12 = smov 256   ;;  %s963_s17 = smov 16  }
  0x51   : > { %197 = dma.hbm_to_vmem [thread:$0]  %s1250_s1, 256, %s192_s29, [#allocation7], %s962_s12, %s962_s12, %s963_s17  }
  0x52 PF: > { %p645_p11 = scmp.ge.s32.totalorder %s956_s16, 1  ;;  %p199_p0 = scmp.lt.s32.totalorder %s956_s16, 3 }
  0x54   : > { %p200_p1 = pnand %p645_p11, %p199_p0 }
  0x55   : > { %s205_s23 = sand.u32 (!%p200_p1), 1, %s944_s13  }
  0x56   : > { %203 = sbr.rel (%p200_p1) target bundleno = 212 (0xd4), region = 28  ;;  %s646_s27 = sshll.u32 (!%p200_p1), %s205_s23, 5 }
  0x57   : > { %s206_s30 = scalar_lea.sflag (!%p200_p1), [#allocation4], %s205_s23  ;;  %s209_s3 = scalar_lea.vmem (!%p200_p1), [#allocation3], %s646_s27 }
  0x5d   : > { %910 = dma.done.wait (%p1031_p6), %s206_s30, 512  }
  0x5e   : > { %912 = vsyncadd (%p1031_p6), %s206_s30, 4294966784  ;;  %s215_s29 = scalar_lea.sflag [#allocation7], %s205_s23  ;;  %s1091_s4 = scalar_lea.vmem [#allocation6], %s646_s27 }
  0x5f   : > { %914 = dma.done.wait (%p1031_p6), %s215_s29, 512  }
  0x60   : > { %916 = vsyncadd (%p1031_p6), %s215_s29, 4294966784  ;;  %s241_s5 = sand.u32 1, %s932_s10   ;;  %s668_s6 = sshll.u32 %s948_s14, 12  ;;  %v964_v0 = vmov 0.0   ;;  %v1105_v1 = vld [vmem:[%s209_s3] sm:$0xff]  ;;  %v1107_v2 = vld [vmem:[%s209_s3 + $0x8] sm:$0xff] }
  0x61   : > { %s1101_s7 = sshll.u32 %s241_s5, 5  ;;  %263 = vst [vmem:[#allocation2] sm:$0xff] %v964_v0  ;;  %264 = vst [vmem:[#allocation2 + $0x8] sm:$0xff] %v964_v0  ;;  %s1103_s8 = sadd.s32 4096, %s668_s6  ;;  %v1109_v3 = vld [vmem:[%s209_s3 + $0x10] sm:$0xff]  ;;  %v1111_v4 = vld [vmem:[%s209_s3 + $0x18] sm:$0xff] }
  0x62   : > { %265 = vst [vmem:[#allocation2 + $0x10] sm:$0xff] %v964_v0  ;;  %266 = vst [vmem:[#allocation2 + $0x18] sm:$0xff] %v964_v0  ;;  %v275_v5 = vand.u32 2147483647, %v1105_v1  ;;  %v276_v6 = vand.u32 2147483647, %v1107_v2 }
  0x63   : > { %v277_v7 = vand.u32 2147483647, %v1109_v3  ;;  %v278_v8 = vand.u32 2147483647, %v1111_v4  ;;  %vm351_vm0 = vcmp.ge.f32.partialorder %v1105_v1, 0.0  ;;  %v271_v27 = vld [vmem:[%s1091_s4] sm:$0xff] }
  0x64   : > { %v279_v9 = vsub.f32 0.0, %v275_v5  ;;  %v280_v10 = vsub.f32 0.0, %v276_v6  ;;  %vm352_vm1 = vcmp.ge.f32.partialorder %v1107_v2, 0.0  ;;  %v272_v30 = vld [vmem:[%s1091_s4 + $0x8] sm:$0xff]  ;;  %v291_v31 = vmax.f32 %v1105_v1, 0.0  ;;  %v273_v34 = vld [vmem:[%s1091_s4 + $0x10] sm:$0xff] }
  0x65   : > { %v281_v11 = vsub.f32 0.0, %v277_v7  ;;  %v282_v12 = vsub.f32 0.0, %v278_v8  ;;  %vm353_vm2 = vcmp.ge.f32.partialorder %v1109_v3, 0.0  ;;  %vm354_vm3 = vcmp.ge.f32.partialorder %v1111_v4, 0.0  ;;  %v274_v37 = vld [vmem:[%s1091_s4 + $0x18] sm:$0xff]  ;;  %s1180_s21 = scalar_lea.vmem [#allocation8], %s1101_s7 }
  0x66   : > { %v283_v13 = vmul.f32 1.442695, %v279_v9  ;;  %v285_v14 = vmul.f32 1.442695, %v280_v10  ;;  %v295_v41 = vmul.f32 %v271_v27, %v1105_v1  ;;  %v296_v42 = vmul.f32 %v272_v30, %v1107_v2  ;;  %p654_p6 = scmp.gt.s32.totalorder %s1103_s8, 2048 }
  0x67   : > { %v287_v15 = vmul.f32 1.442695, %v281_v11  ;;  %v289_v16 = vmul.f32 1.442695, %v282_v12  ;;  %v292_v49 = vmax.f32 %v1107_v2, 0.0  ;;  %v293_v53 = vmax.f32 %v1109_v3, 0.0 }
  0x68   : > { %757 = vpow2.f32 %v283_v13  ;;  %v294_v61 = vmax.f32 %v1111_v4, 0.0  ;;  %v297_v5 = vmul.f32 %v273_v34, %v1109_v3 }
  0x69   : > { %759 = vpow2.f32 %v285_v14 }
  0x6a   : > { %761 = vpow2.f32 %v287_v15 }
  0x6b   : > { %763 = vpow2.f32 %v289_v16 }
  0x72   : > { %v1117_v17 = vpop.eup %757 }
  0x73   : > { %v1119_v18 = vpop.eup %759  ;;  %v303_v21 = vadd.f32 1.0, %v1117_v17  ;;  %v306_v45 = vmul.f32 -0.5, %v1117_v17  ;;  %v309_v57 = vand.u32 2147483647, %v1117_v17 }
  0x74   : > { %v1121_v19 = vpop.eup %761  ;;  %v312_v22 = vadd.f32 1.0, %v1119_v18  ;;  %v315_v50 = vmul.f32 -0.5, %v1119_v18  ;;  %v318_v10 = vand.u32 2147483647, %v1119_v18 }
  0x75   : > { %v1123_v20 = vpop.eup %763  ;;  %v321_v23 = vadd.f32 1.0, %v1121_v19  ;;  %765 = vrcp.f32 %v303_v21  ;;  %v324_v54 = vmul.f32 -0.5, %v1121_v19  ;;  %v307_v62 = vadd.f32 1.0, %v306_v45 }
  0x76   : > { %v330_v24 = vadd.f32 1.0, %v1123_v20  ;;  %767 = vrcp.f32 %v312_v22  ;;  %v333_v58 = vmul.f32 -0.5, %v1123_v20  ;;  %v316_v6 = vadd.f32 1.0, %v315_v50 }
  0x77   : > { %769 = vrcp.f32 %v321_v23  ;;  %v325_v11 = vadd.f32 1.0, %v324_v54  ;;  %v327_v14 = vand.u32 2147483647, %v1121_v19  ;;  %v336_v3 = vand.u32 2147483647, %v1123_v20 }
  0x78   : > { %771 = vrcp.f32 %v330_v24  ;;  %v334_v15 = vadd.f32 1.0, %v333_v58  ;;  %vm1161_vm4 = vcmp.lt.f32.partialorder %v309_v57, 0.0004427343  ;;  %vm1167_vm5 = vcmp.lt.f32.partialorder %v318_v10, 0.0004427343  ;;  %v401_v58 = vld [vmem:[#allocation2 + $0x18] sm:$0xff] (!%p654_p6) }
  0x79   : > { %773 = vlog2.f32 %v303_v21  ;;  %vm328_vm6 = vcmp.lt.f32.partialorder %v327_v14, 0.0004427343  ;;  %vm337_vm7 = vcmp.lt.f32.partialorder %v336_v3, 0.0004427343 }
  0x7a   : > { %775 = vlog2.f32 %v312_v22 }
  0x7b   : > { %777 = vlog2.f32 %v321_v23  ;;  %v308_v23 = vmul.f32 %v1117_v17, %v307_v62 }
  0x7c   : > { %779 = vlog2.f32 %v330_v24 }
  0x7f   : > { %v766_v25 = vpop.eup %765 }
  0x80   : > { %v768_v26 = vpop.eup %767  ;;  %v355_v28 = vmul.f32 %v766_v25, %v1117_v17  ;;  %v326_v17 = vmul.f32 %v1121_v19, %v325_v11 }
  0x81   : > { %v770_v29 = vpop.eup %769  ;;  %v356_v32 = vmul.f32 %v768_v26, %v1119_v18 }
  0x82   : > { %v772_v33 = vpop.eup %771  ;;  %v357_v35 = vmul.f32 %v770_v29, %v1121_v19  ;;  %v359_v36 = vsel %vm351_vm0, %v766_v25, %v355_v28 }
  0x83   : > { %v358_v38 = vmul.f32 %v772_v33, %v1123_v20  ;;  %v360_v39 = vsel %vm352_vm1, %v768_v26, %v356_v32  ;;  %v363_v40 = vsub.f32 %v359_v36, %v271_v27  ;;  %v774_v2 = vpop.eup %773  ;;  %v317_v26 = vmul.f32 %v1119_v18, %v316_v6 }
  0x84   : > { %v361_v43 = vsel %vm353_vm2, %v770_v29, %v357_v35  ;;  %v364_v44 = vsub.f32 %v360_v39, %v272_v30  ;;  %v776_v9 = vpop.eup %775  ;;  %v305_v22 = vmul.f32 0.6931472, %v774_v2  ;;  %v298_v27 = vmul.f32 %v274_v37, %v1111_v4 }
  0x85   : > { %v362_v46 = vsel %vm354_vm3, %v772_v33, %v358_v38  ;;  %v365_v47 = vsub.f32 %v361_v43, %v273_v34  ;;  %v649_v48 = vadd.f32 -1.0, %v363_v40  ;;  %v778_v13 = vpop.eup %777  ;;  %v314_v25 = vmul.f32 0.6931472, %v776_v9 }
  0x86   : > { %v366_v51 = vsub.f32 %v362_v46, %v274_v37  ;;  %v650_v52 = vadd.f32 -1.0, %v364_v44  ;;  %v780_v21 = vpop.eup %779  ;;  %v323_v29 = vmul.f32 0.6931472, %v778_v13  ;;  %v299_v30 = vsub.f32 %v291_v31, %v295_v41 }
  0x87   : > { %v651_v55 = vadd.f32 -1.0, %v365_v47  ;;  %v371_v56 = vmul.f32 19.96008, %v649_v48  ;;  %v332_v32 = vmul.f32 0.6931472, %v780_v21  ;;  %v335_v33 = vmul.f32 %v1123_v20, %v334_v15 }
  0x88   : > { %v652_v59 = vadd.f32 -1.0, %v366_v51  ;;  %v372_v60 = vmul.f32 19.96008, %v650_v52  ;;  %v300_v34 = vsub.f32 %v292_v49, %v296_v42  ;;  %v311_v18 = vsel %vm1161_vm4, %v308_v23, %v305_v22  ;;  %v398_v51 = vld [vmem:[#allocation2] sm:$0xff] (!%p654_p6) }
  0x89   : > { %v373_v63 = vmul.f32 19.96008, %v651_v55  ;;  %v375_v0 = vmul.f32 1.442695, %v371_v56  ;;  %v301_v4 = vsub.f32 %v293_v53, %v297_v5  ;;  %v320_v35 = vsel %vm1167_vm5, %v317_v26, %v314_v25  ;;  %v399_v53 = vld [vmem:[#allocation2 + $0x8] sm:$0xff] (!%p654_p6)  ;;  %v400_v55 = vld [vmem:[#allocation2 + $0x10] sm:$0xff] (!%p654_p6) }
  0x8a   : > { %v374_v7 = vmul.f32 19.96008, %v652_v59  ;;  %v377_v8 = vmul.f32 1.442695, %v372_v60  ;;  %v302_v36 = vsub.f32 %v294_v61, %v298_v27  ;;  %v329_v37 = vsel %vm328_vm6, %v326_v17, %v323_v29 }
  0x8b   : > { %781 = vpow2.f32 %v375_v0  ;;  %v379_v12 = vmul.f32 1.442695, %v373_v63  ;;  %v338_v38 = vsel %vm337_vm7, %v335_v33, %v332_v32  ;;  %v339_v19 = vadd.f32 %v311_v18, %v299_v30 }
  0x8c   : > { %783 = vpow2.f32 %v377_v8  ;;  %v381_v16 = vmul.f32 1.442695, %v374_v7  ;;  %v340_v31 = vadd.f32 %v320_v35, %v300_v34  ;;  %v341_v40 = vadd.f32 %v329_v37, %v301_v4 }
  0x8d   : > { %785 = vpow2.f32 %v379_v12  ;;  %v342_v42 = vadd.f32 %v338_v38, %v302_v36 }
  0x8e   : > { %787 = vpow2.f32 %v381_v16 }
  0x95   : > { %v782_v1 = vpop.eup %781  ;;  %397 = sbr.rel (%p654_p6) target bundleno = 162 (0xa2), region = 44 }
  0x96   : > { %v784_v39 = vpop.eup %783  ;;  %v383_v41 = vsub.f32 1.0, %v782_v1 }
  0x97   : > { %v786_v20 = vpop.eup %785  ;;  %v384_v43 = vsub.f32 1.0, %v784_v39 }
  0x98   : > { %v788_v44 = vpop.eup %787  ;;  %v385_v45 = vsub.f32 1.0, %v786_v20  ;;  %v387_v46 = vmul.f32 %v383_v41, %v339_v19 }
  0x99   : > { %v386_v47 = vsub.f32 1.0, %v788_v44  ;;  %v388_v48 = vmul.f32 %v384_v43, %v340_v31 }
  0x9a   : > { %v389_v49 = vmul.f32 %v385_v45, %v341_v40 }
  0x9b   : > { %v390_v50 = vmul.f32 %v386_v47, %v342_v42 }
  0x9c   : > { %v406_v52 = vcombine.low %v387_v46, %v389_v49  ;;  %v407_v54 = vcombine.high %v387_v46, %v389_v49 }
  0x9d   : > { %v408_v56 = vcombine.low %v388_v48, %v390_v50  ;;  %v409_v57 = vcombine.high %v388_v48, %v390_v50 }
  0x9e   : > { %v414_v59 = vadd.f32 %v406_v52, %v398_v51  ;;  %v415_v60 = vadd.f32 %v407_v54, %v399_v53 }
  0x9f   : > { %v416_v61 = vadd.f32 %v408_v56, %v400_v55  ;;  %v417_v62 = vadd.f32 %v409_v57, %v401_v58 }
  0xa0   : > { %418 = vst [vmem:[#allocation2] sm:$0xff] %v414_v59  ;;  %419 = vst [vmem:[#allocation2 + $0x8] sm:$0xff] %v415_v60 }
  0xa1   : > { %420 = vst [vmem:[#allocation2 + $0x10] sm:$0xff] %v416_v61  ;;  %421 = vst [vmem:[#allocation2 + $0x18] sm:$0xff] %v417_v62 }
  0xa2 PF: > { %p655_p2 = scmp.le.s32.totalorder %s1103_s8, 2048 }
  0xa3   : > { %v425_v63 = vlaneseq (!%p655_p2)  ;;  %s656_s20 = sshll.u32 (!%p655_p2), %s948_s14, 3  ;;  %v452_v11 = vcombine.low (!%p655_p2), %v387_v46, %v389_v49  ;;  %v453_v12 = vcombine.high (!%p655_p2), %v387_v46, %v389_v49  ;;  %v454_v13 = vcombine.low (!%p655_p2), %v388_v48, %v390_v50 }
  0xa4   : > { %424 = sbr.rel (%p655_p2) target bundleno = 179 (0xb3), region = 48  ;;  %v433_v0 = vstv (!%p655_p2), %s656_s20  ;;  %v455_v14 = vcombine.high (!%p655_p2), %v388_v48, %v390_v50 }
  0xa5   : > { %v426_v2 = vshrl.u32 (!%p655_p2), %v425_v63, 7  ;;  %v428_v5 = vand.u32 (!%p655_p2), 127, %v425_v63 }
  0xa7   : > { %v434_v6 = vadd.s32 (!%p655_p2), %v433_v0, %v426_v2  ;;  %v429_v7 = vadd.s32 (!%p655_p2), 128, %v428_v5  ;;  %v430_v8 = vadd.s32 (!%p655_p2), 256, %v428_v5  ;;  %v431_v9 = vadd.s32 (!%p655_p2), 384, %v428_v5  ;;  %v440_v16 = vld [vmem:[#allocation2] sm:$0xff] (!%p655_p2)  ;;  %v441_v3 = vld [vmem:[#allocation2 + $0x8] sm:$0xff] (!%p655_p2) }
  0xa8   : > { %v442_v24 = vld [vmem:[#allocation2 + $0x10] sm:$0xff] (!%p655_p2)  ;;  %v443_v25 = vld [vmem:[#allocation2 + $0x18] sm:$0xff] (!%p655_p2) }
  0xa9   : > { %v435_v10 = vmul.u32 (!%p655_p2), 512, %v434_v6 }
  0xab   : > { %v436_v15 = vadd.s32 %v435_v10, %v428_v5  ;;  %v437_v21 = vadd.s32 %v435_v10, %v429_v7  ;;  %v438_v22 = vadd.s32 %v435_v10, %v430_v8  ;;  %v439_v23 = vadd.s32 %v435_v10, %v431_v9 }
  0xad   : > { %vm444_vm8 = vcmp.lt.s32.totalorder %v436_v15, 2048  ;;  %vm445_vm9 = vcmp.lt.s32.totalorder %v437_v21, 2048  ;;  %vm446_vm10 = vcmp.lt.s32.totalorder %v438_v22, 2048  ;;  %vm447_vm11 = vcmp.lt.s32.totalorder %v439_v23, 2048 }
  0xae   : > { %v460_v26 = vsel %vm444_vm8, %v452_v11, 0.0  ;;  %v461_v27 = vsel %vm445_vm9, %v453_v12, 0.0  ;;  %v462_v28 = vsel %vm446_vm10, %v454_v13, 0.0  ;;  %v463_v29 = vsel %vm447_vm11, %v455_v14, 0.0 }
  0xaf   : > { %v464_v17 = vadd.f32 %v460_v26, %v440_v16  ;;  %v465_v30 = vadd.f32 %v461_v27, %v441_v3  ;;  %v466_v32 = vadd.f32 %v462_v28, %v442_v24  ;;  %v467_v33 = vadd.f32 %v463_v29, %v443_v25 }
  0xb1   : > { %468 = vst [vmem:[#allocation2] sm:$0xff] %v464_v17  ;;  %469 = vst [vmem:[#allocation2 + $0x8] sm:$0xff] %v465_v30 }
  0xb2   : > { %470 = vst [vmem:[#allocation2 + $0x10] sm:$0xff] %v466_v32  ;;  %471 = vst [vmem:[#allocation2 + $0x18] sm:$0xff] %v467_v33 }
  0xb3 PF: > { %s670_s28 = sshll.u32 %s948_s14, 9  ;;  %s522_s12 = sshll.u32 %s1180_s21, 4  ;;  %s1192_s12 = int_to_ptr.vmem [resolvable:$true] %s522_s12 }
  0xb4   : > { %s1190_s22 = scalar_lea.hbm %s1251_s2, %s670_s28  ;;  %s508_s14 = scalar_lea.sflag [#allocation5], %s241_s5 }
  0xb5   : > { %s845_s23 = scalar_lea.vmem %s1192_s12, 512  ;;  %s965_s27 = smov [#allocation8]  }
  0xb6   : > { %p846_p3 = scmp.ne.s32.totalorder %s1192_s12, %s845_s23  ;;  %s849_s30 = sshll.u32 %s965_s27, 4  ;;  %s850_s30 = int_to_ptr.vmem [resolvable:$false] %s849_s30 }
  0xb7   : > { %s851_s3 = scalar_lea.vmem %s850_s30, 1024  ;;  %p852_p7 = scmp.lt.s32.totalorder %s1192_s12, %s850_s30 }
  0xb8   : > { %v475_v34 = vld [vmem:[#allocation2] sm:$0xff]  ;;  %v476_v18 = vld [vmem:[#allocation2 + $0x8] sm:$0xff]  ;;  %p847_p5 = pnand %p846_p3, %p1045_p12  ;;  %p853_p8 = scmp.lt.s32.totalorder %s851_s3, %s845_s23 }
  0xb9   : > { %v477_v4 = vld [vmem:[#allocation2 + $0x10] sm:$0xff]  ;;  %v479_v35 = vrot.slane %v475_v34, 4  ;;  %v485_v36 = vrot.slane %v476_v18, 4  ;;  %v478_v38 = vld [vmem:[#allocation2 + $0x18] sm:$0xff] }
  0xba   : > { %v491_v37 = vrot.slane %v477_v4, 4  ;;  %v497_v19 = vrot.slane %v478_v38, 4  ;;  %p848_p4 = pneg %p847_p5  ;;  %p854_p9 = por %p853_p8, %p852_p7 }
  0xbb   : > { %v480_v1 = vadd.f32 %v479_v35, %v475_v34  ;;  %v486_v31 = vadd.f32 %v485_v36, %v476_v18 }
  0xbc   : > { %v492_v39 = vadd.f32 %v491_v37, %v477_v4  ;;  %v498_v40 = vadd.f32 %v497_v19, %v478_v38  ;;  %p855_p10 = pnand %p854_p9, %p848_p4 }
  0xbd   : > { %v481_v41 = vrot.slane %v480_v1, 2  ;;  %v487_v20 = vrot.slane %v486_v31, 2 }
  0xbe   : > { %v493_v42 = vrot.slane %v492_v39, 2  ;;  %v499_v43 = vrot.slane %v498_v40, 2 }
  0xbf   : > { %v482_v44 = vadd.f32 %v481_v41, %v480_v1  ;;  %v488_v45 = vadd.f32 %v487_v20, %v486_v31 }
  0xc0   : > { %v494_v46 = vadd.f32 %v493_v42, %v492_v39  ;;  %v500_v47 = vadd.f32 %v499_v43, %v498_v40 }
  0xc1   : > { %v483_v48 = vrot.slane %v482_v44, 1  ;;  %v489_v49 = vrot.slane %v488_v45, 1 }
  0xc2   : > { %v495_v50 = vrot.slane %v494_v46, 1  ;;  %v501_v51 = vrot.slane %v500_v47, 1 }
  0xc3   : > { %v484_v52 = vadd.f32 %v483_v48, %v482_v44  ;;  %v490_v53 = vadd.f32 %v489_v49, %v488_v45 }
  0xc4   : > { %v496_v54 = vadd.f32 %v495_v50, %v494_v46  ;;  %v502_v55 = vadd.f32 %v501_v51, %v500_v47 }
  0xc5   : > { %503 = vst [vmem:[%s1180_s21] sm:$0xff] %v484_v52  ;;  %504 = vst [vmem:[%s1180_s21 + $0x8] sm:$0xff] %v490_v53 }
  0xc6   : > { %505 = vst [vmem:[%s1180_s21 + $0x10] sm:$0xff] %v496_v54  ;;  %506 = vst [vmem:[%s1180_s21 + $0x18] sm:$0xff] %v502_v55 }
  0xc7   : > { %858 = shalt.err (!%p855_p10)
}
  0xc8   : > { %s859_s29 = scalar_lea.hbm %s1190_s22, 512  ;;  %s863_s6 = scalar_lea.hbm %s1251_s2, 1024 }
  0xc9   : > { %p860_p11 = scmp.ne.s32.totalorder %s1190_s22, %s859_s29  ;;  %p864_p6 = scmp.lt.u32.totalorder %s1190_s22, %s1251_s2 }
  0xca   : > { %p865_p2 = scmp.lt.u32.totalorder %s863_s6, %s859_s29  ;;  %p867_p5 = scmp.lt.u32.totalorder %s859_s29, %s1190_s22 }
  0xcb   : > { %p861_p0 = pnand %p860_p11, %p1045_p12 }
  0xcc   : > { %p866_p3 = por %p865_p2, %p864_p6 }
  0xcd   : > { %p862_p1 = pneg %p861_p0 }
  0xce   : > { %p868_p4 = por %p867_p5, %p866_p3 }
  0xd0   : > { %p869_p7 = pnand %p868_p4, %p862_p1 }
  0xd2   : > { %872 = shalt.err (!%p869_p7)
}
  0xd3   : > { %673 = dma.vmem_to_hbm [thread:$0]  (%p1045_p12), %s1192_s12, 512, %s1190_s22, %s508_s14  }
  0xd4 PF: > { %s534_s21 = sand.u32 1, %s928_s9   ;;  %p1261_p8 = scmp.ge.s32.totalorder %s956_s16, 2 }
  0xd5   : > { %s535_s20 = scalar_lea.sflag [#allocation5], %s534_s21 }
  0xd6   : > { %p676_p9 = pnand %p1261_p8, %p1049_p13 }
  0xd8   : > { %918 = dma.done.wait (!%p676_p9), %s535_s20, 512  }
  0xd9   : > { %920 = vsyncadd (!%p676_p9), %s535_s20, 4294966784  ;;  %s21_s16 = sadd.s32 1, %s956_s16   ;;  %s1262_s9 = smov %s932_s10 }
  0xda   : > { %p18_p10 = scmp.ge.s32.totalorder %s21_s16, 4   ;;  %s1263_s10 = smov %s936_s11 }
  0xdb   : > { %s1264_s11 = smov %s1039_s24  ;;  %s1265_s12 = smov %s944_s13 }
  0xdc   : > { %s1239_s13 = smov 0   ;;  %s1266_s14 = smov %s952_s15 }
  0xdd   : > { %s1267_s15 = smov %s1269_s19  ;;  %20 = sbr.rel (!%p18_p10) target bundleno = 9 (0x9), region = 102 }
  0xe4   :  { %540 = vsyncpa [#allocation4], 1 }
  0xe5   :  { %542 = vsyncpa [#allocation4 + $0x1], 1 }
  0xe6   :  { %543 = vsyncpa [#allocation7], 1 }
  0xe7   :  { %545 = vsyncpa [#allocation7 + $0x1], 1 }
  0xe8   :  { %546 = vsyncpa [#allocation5], 1 }
  0xe9   :  { %548 = vsyncpa [#allocation5 + $0x1], 1 }

</bundles_post_ra>
